<compile_context>
chip_gen: v5e
topology: v5e:2x2
jax: 0.10.0
libtpu: 0.0.40
codegen_flags: <defaults>
</compile_context>

<pallas_src>
import jax
import jax.numpy as jnp
from jax.experimental import pallas as pl
from jax.experimental.pallas import tpu as pltpu


def mlp_kernel(x_ref, w1_ref, b1_ref, w2_ref, b2_ref, w3_ref, b3_ref, o_ref):
    # fc1 + relu  (bf16 inputs, f32 accumulate, f32 bias add)
    x = x_ref[...]
    h1 = jnp.dot(x, w1_ref[...], preferred_element_type=jnp.float32) + b1_ref[...]
    h1 = jnp.maximum(h1, 0.0).astype(jnp.bfloat16)
    # fc2 + relu
    h2 = jnp.dot(h1, w2_ref[...], preferred_element_type=jnp.float32) + b2_ref[...]
    h2 = jnp.maximum(h2, 0.0).astype(jnp.bfloat16)
    # fc3
    logits = jnp.dot(h2, w3_ref[...], preferred_element_type=jnp.float32) + b3_ref[...]
    # Closed-form 2-class log_softmax (no cross-lane reductions):
    #   log p0 = -softplus(d),  log p1 = d - softplus(d),  d = l1 - l0
    d = logits[:, 1:2] - logits[:, 0:1]
    sp = jnp.maximum(d, 0.0) + jnp.log1p(jnp.exp(-jnp.abs(d)))  # stable softplus
    o_ref[...] = jnp.concatenate([-sp, d - sp], axis=1)


def complex_neural_network_forward(x, params, tile_b=1024):
    """x: (B, 30) float32 -> (B, 2) float32 log-probabilities."""
    w1, b1, w2, b2, w3, b3 = params
    B, F = x.shape

    # Pick a batch tile: multiple of 8 (f32/bf16 sublane), capped at tile_b.
    tb = min(int(tile_b), max(8, ((B + 7) // 8) * 8))
    num_tiles = pl.cdiv(B, tb)
    b_pad = num_tiles * tb
    if b_pad != B:
        x = jnp.pad(x, ((0, b_pad - B), (0, 0)))

    # bf16 for the streamed input and the matmul weights; biases stay f32.
    x_bf = x.astype(jnp.bfloat16)
    w1_bf = w1.astype(jnp.bfloat16)
    w2_bf = w2.astype(jnp.bfloat16)
    w3_bf = w3.astype(jnp.bfloat16)

    def full_spec(arr):
        # Whole-array block, constant index -> stays resident in VMEM across grid.
        return pl.BlockSpec(arr.shape, lambda i: (0, 0))

    out = pl.pallas_call(
        mlp_kernel,
        out_shape=jax.ShapeDtypeStruct((b_pad, 2), jnp.float32),
        grid=(num_tiles,),
        in_specs=[
            pl.BlockSpec((tb, F), lambda i: (i, 0)),   # x: streamed per batch tile
            full_spec(w1_bf), full_spec(b1),
            full_spec(w2_bf), full_spec(b2),
            full_spec(w3_bf), full_spec(b3),
        ],
        out_specs=pl.BlockSpec((tb, 2), lambda i: (i, 0)),
        compiler_params=pltpu.CompilerParams(
            dimension_semantics=("parallel",)),
    )(x_bf, w1_bf, b1, w2_bf, b2, w3_bf, b3)

    return out[:B]


def init_params(key):
    """Deterministic synthetic parameters matching the PyTorch module shapes.

    PyTorch nn.Linear(in, out) stores weight as (out, in); we store the
    transpose (in, out) so the kernel does x @ W + b."""
    keys = jax.random.split(key, 6)
    w1 = jax.random.normal(keys[0], (30, 64), jnp.float32) * 0.1
    b1 = jax.random.normal(keys[1], (1, 64), jnp.float32) * 0.1
    w2 = jax.random.normal(keys[2], (64, 32), jnp.float32) * 0.1
    b2 = jax.random.normal(keys[3], (1, 32), jnp.float32) * 0.1
    w3 = jax.random.normal(keys[4], (32, 2), jnp.float32) * 0.1
    b3 = jax.random.normal(keys[5], (1, 2), jnp.float32) * 0.1
    return (w1, b1, w2, b2, w3, b3)


def reference_forward(x, params, mixed=False):
    """Pure-JAX reference of the PyTorch forward pass.

    mixed=True mirrors the kernel's bf16-input / f32-accumulate matmuls."""
    w1, b1, w2, b2, w3, b3 = params

    def mm(a, w):
        if mixed:
            return jnp.dot(a.astype(jnp.bfloat16), w.astype(jnp.bfloat16),
                           preferred_element_type=jnp.float32)
        return a @ w

    h1 = jnp.maximum(mm(x, w1) + b1, 0.0)
    h2 = jnp.maximum(mm(h1, w2) + b2, 0.0)
    logits = mm(h2, w3) + b3
    return jax.nn.log_softmax(logits, axis=1)


if __name__ == "__main__":
    key = jax.random.PRNGKey(0)
    k_x, k_p, k_x2 = jax.random.split(key, 3)
    params = init_params(k_p)

    # Small, sublane-aligned batch.
    B = 8
    x = jax.random.normal(k_x, (B, 30), jnp.float32)
    out = jax.block_until_ready(complex_neural_network_forward(x, params))
    assert out.shape == (B, 2), out.shape
    ref_mixed = reference_forward(x, params, mixed=True)
    ref_f32 = reference_forward(x, params, mixed=False)
    assert jnp.allclose(out, ref_mixed, atol=2e-3, rtol=2e-3), (
        f"max abs err vs mixed ref = {jnp.max(jnp.abs(out - ref_mixed))}")
    assert jnp.allclose(out, ref_f32, atol=3e-2, rtol=3e-2), (
        f"max abs err vs f32 ref = {jnp.max(jnp.abs(out - ref_f32))}")

    # Ragged batch (exercises the padding / tail handling path + multi-tile grid).
    B2 = 37
    x2 = jax.random.normal(k_x2, (B2, 30), jnp.float32)
    out2 = jax.block_until_ready(complex_neural_network_forward(x2, params, tile_b=16))
    assert out2.shape == (B2, 2), out2.shape
    ref2 = reference_forward(x2, params, mixed=True)
    assert jnp.allclose(out2, ref2, atol=2e-3, rtol=2e-3), (
        f"max abs err (ragged) = {jnp.max(jnp.abs(out2 - ref2))}")

    print("KERNEL_OK")
</pallas_src>

<mosaic_0001>
module attributes {stable_mosaic.version = 11 : i64} {
  func.func @mlp_kernel(%arg0: i32, %arg1: memref<8x30xbf16, #tpu.memory_space<vmem>>, %arg2: memref<30x64xbf16, #tpu.memory_space<vmem>>, %arg3: memref<1x64xf32, #tpu.memory_space<vmem>>, %arg4: memref<64x32xbf16, #tpu.memory_space<vmem>>, %arg5: memref<1x32xf32, #tpu.memory_space<vmem>>, %arg6: memref<32x2xbf16, #tpu.memory_space<vmem>>, %arg7: memref<1x2xf32, #tpu.memory_space<vmem>>, %arg8: memref<8x2xf32, #tpu.memory_space<vmem>>) attributes {dimension_semantics = [#tpu.dimension_semantics<parallel>], iteration_bounds = array<i64: 1>, scalar_prefetch = 0 : i64, scratch_operands = 0 : i64, tpu.core_type = #tpu.core_type<tc>, window_params = [{transform_indices = @transform_0, window_bounds = array<i64: 8, 30>}, {pipeline_mode = #tpu.pipeline_mode<synchronous>, transform_indices = @transform_1, window_bounds = array<i64: 30, 64>}, {pipeline_mode = #tpu.pipeline_mode<synchronous>, transform_indices = @transform_2, window_bounds = array<i64: 1, 64>}, {pipeline_mode = #tpu.pipeline_mode<synchronous>, transform_indices = @transform_3, window_bounds = array<i64: 64, 32>}, {pipeline_mode = #tpu.pipeline_mode<synchronous>, transform_indices = @transform_4, window_bounds = array<i64: 1, 32>}, {pipeline_mode = #tpu.pipeline_mode<synchronous>, transform_indices = @transform_5, window_bounds = array<i64: 32, 2>}, {pipeline_mode = #tpu.pipeline_mode<synchronous>, transform_indices = @transform_6, window_bounds = array<i64: 1, 2>}, {transform_indices = @transform_7, window_bounds = array<i64: 8, 2>}]} {
    %c0 = arith.constant 0 : index
    %c0_0 = arith.constant 0 : index
    %0 = vector.load %arg1[%c0, %c0_0] : memref<8x30xbf16, #tpu.memory_space<vmem>>, vector<8x30xbf16>
    %c0_1 = arith.constant 0 : index
    %c0_2 = arith.constant 0 : index
    %1 = vector.load %arg2[%c0_1, %c0_2] : memref<30x64xbf16, #tpu.memory_space<vmem>>, vector<30x64xbf16>
    %cst = arith.constant dense<0.000000e+00> : vector<8x64xf32>
    %2 = tpu.matmul %0, %1, %cst {dimension_numbers = #tpu.dot_dimension_numbers<[1], [0], [0], [1], [0, 0, 1, 1], [], []>} : vector<8x30xbf16>, vector<30x64xbf16>, vector<8x64xf32> -> vector<8x64xf32>
    %c0_3 = arith.constant 0 : index
    %c0_4 = arith.constant 0 : index
    %3 = vector.load %arg3[%c0_3, %c0_4] : memref<1x64xf32, #tpu.memory_space<vmem>>, vector<1x64xf32>
    %4 = vector.broadcast %3 : vector<1x64xf32> to vector<8x64xf32>
    %5 = arith.addf %2, %4 : vector<8x64xf32>
    %cst_5 = arith.constant 0.000000e+00 : f32
    %6 = vector.broadcast %cst_5 : f32 to vector<8x64xf32>
    %7 = arith.maximumf %5, %6 : vector<8x64xf32>
    %8 = arith.truncf %7 : vector<8x64xf32> to vector<8x64xbf16>
    %c0_6 = arith.constant 0 : index
    %c0_7 = arith.constant 0 : index
    %9 = vector.load %arg4[%c0_6, %c0_7] : memref<64x32xbf16, #tpu.memory_space<vmem>>, vector<64x32xbf16>
    %cst_8 = arith.constant dense<0.000000e+00> : vector<8x32xf32>
    %10 = tpu.matmul %8, %9, %cst_8 {dimension_numbers = #tpu.dot_dimension_numbers<[1], [0], [0], [1], [0, 0, 1, 1], [], []>} : vector<8x64xbf16>, vector<64x32xbf16>, vector<8x32xf32> -> vector<8x32xf32>
    %c0_9 = arith.constant 0 : index
    %c0_10 = arith.constant 0 : index
    %11 = vector.load %arg5[%c0_9, %c0_10] : memref<1x32xf32, #tpu.memory_space<vmem>>, vector<1x32xf32>
    %12 = vector.broadcast %11 : vector<1x32xf32> to vector<8x32xf32>
    %13 = arith.addf %10, %12 : vector<8x32xf32>
    %cst_11 = arith.constant 0.000000e+00 : f32
    %14 = vector.broadcast %cst_11 : f32 to vector<8x32xf32>
    %15 = arith.maximumf %13, %14 : vector<8x32xf32>
    %16 = arith.truncf %15 : vector<8x32xf32> to vector<8x32xbf16>
    %c0_12 = arith.constant 0 : index
    %c0_13 = arith.constant 0 : index
    %17 = vector.load %arg6[%c0_12, %c0_13] : memref<32x2xbf16, #tpu.memory_space<vmem>>, vector<32x2xbf16>
    %cst_14 = arith.constant dense<0.000000e+00> : vector<8x2xf32>
    %18 = tpu.matmul %16, %17, %cst_14 {dimension_numbers = #tpu.dot_dimension_numbers<[1], [0], [0], [1], [0, 0, 1, 1], [], []>} : vector<8x32xbf16>, vector<32x2xbf16>, vector<8x2xf32> -> vector<8x2xf32>
    %c0_15 = arith.constant 0 : index
    %c0_16 = arith.constant 0 : index
    %19 = vector.load %arg7[%c0_15, %c0_16] : memref<1x2xf32, #tpu.memory_space<vmem>>, vector<1x2xf32>
    %20 = vector.broadcast %19 : vector<1x2xf32> to vector<8x2xf32>
    %21 = arith.addf %18, %20 : vector<8x2xf32>
    %22 = vector.extract_strided_slice %21 {offsets = [0, 1], sizes = [8, 1], strides = [1, 1]} : vector<8x2xf32> to vector<8x1xf32>
    %23 = vector.extract_strided_slice %21 {offsets = [0, 0], sizes = [8, 1], strides = [1, 1]} : vector<8x2xf32> to vector<8x1xf32>
    %24 = arith.subf %22, %23 : vector<8x1xf32>
    %cst_17 = arith.constant 0.000000e+00 : f32
    %25 = vector.broadcast %cst_17 : f32 to vector<8x1xf32>
    %26 = arith.maximumf %24, %25 : vector<8x1xf32>
    %27 = math.absf %24 : vector<8x1xf32>
    %cst_18 = arith.constant 0.000000e+00 : f32
    %28 = vector.broadcast %cst_18 : f32 to vector<8x1xf32>
    %29 = arith.subf %28, %27 : vector<8x1xf32>
    %30 = math.exp %29 : vector<8x1xf32>
    %31 = math.log1p %30 : vector<8x1xf32>
    %32 = arith.addf %26, %31 : vector<8x1xf32>
    %cst_19 = arith.constant 0.000000e+00 : f32
    %33 = vector.broadcast %cst_19 : f32 to vector<8x1xf32>
    %34 = arith.subf %33, %32 : vector<8x1xf32>
    %35 = arith.subf %24, %32 : vector<8x1xf32>
    %36 = tpu.concatenate %34, %35 in 1 : vector<8x1xf32>, vector<8x1xf32> -> vector<8x2xf32>
    %c0_20 = arith.constant 0 : index
    %c0_21 = arith.constant 0 : index
    %37 = vector.load %arg8[%c0_20, %c0_21] : memref<8x2xf32, #tpu.memory_space<vmem>>, vector<8x2xf32>
    tpu.vector_store %arg8[%c0_20, %c0_21], %36 {strides = array<i32>} : memref<8x2xf32, #tpu.memory_space<vmem>>, vector<8x2xf32>,
    return
  }
  func.func @transform_0(%arg0: i32) -> (i32, i32) {
    %c0_i32 = arith.constant 0 : i32
    %c0_i32_0 = arith.constant 0 : i32
    return %arg0, %c0_i32 : i32, i32
  }
  func.func @transform_1(%arg0: i32) -> (i32, i32) {
    %c0_i32 = arith.constant 0 : i32
    %c0_i32_0 = arith.constant 0 : i32
    %c0_i32_1 = arith.constant 0 : i32
    return %c0_i32, %c0_i32_0 : i32, i32
  }
  func.func @transform_2(%arg0: i32) -> (i32, i32) {
    %c0_i32 = arith.constant 0 : i32
    %c0_i32_0 = arith.constant 0 : i32
    %c0_i32_1 = arith.constant 0 : i32
    return %c0_i32, %c0_i32_0 : i32, i32
  }
  func.func @transform_3(%arg0: i32) -> (i32, i32) {
    %c0_i32 = arith.constant 0 : i32
    %c0_i32_0 = arith.constant 0 : i32
    %c0_i32_1 = arith.constant 0 : i32
    return %c0_i32, %c0_i32_0 : i32, i32
  }
  func.func @transform_4(%arg0: i32) -> (i32, i32) {
    %c0_i32 = arith.constant 0 : i32
    %c0_i32_0 = arith.constant 0 : i32
    %c0_i32_1 = arith.constant 0 : i32
    return %c0_i32, %c0_i32_0 : i32, i32
  }
  func.func @transform_5(%arg0: i32) -> (i32, i32) {
    %c0_i32 = arith.constant 0 : i32
    %c0_i32_0 = arith.constant 0 : i32
    %c0_i32_1 = arith.constant 0 : i32
    return %c0_i32, %c0_i32_0 : i32, i32
  }
  func.func @transform_6(%arg0: i32) -> (i32, i32) {
    %c0_i32 = arith.constant 0 : i32
    %c0_i32_0 = arith.constant 0 : i32
    %c0_i32_1 = arith.constant 0 : i32
    return %c0_i32, %c0_i32_0 : i32, i32
  }
  func.func @transform_7(%arg0: i32) -> (i32, i32) {
    %c0_i32 = arith.constant 0 : i32
    %c0_i32_0 = arith.constant 0 : i32
    return %arg0, %c0_i32 : i32, i32
  }
}

</mosaic_0001>

<bundles_post_ra>
// kernel: tpu_custom_call.1
= control target key start
LH: loop header
LB: loop body
LE: loop exit
PB: predicated region body
PF: predicated region fallthrough
CT: control target
= control target key end

     0   :  { %vm51_vm0 = vcmask 1046528   ;;  %vm47_vm1 = vcmask 244736   ;;  %vm106_vm2 = vcmask 523264   ;;  %vm145_vm3 = vcmask 261120   ;;  %s248_s23 = smov 1   ;;  %s332_s1 = inlined_call_operand.vmem [shape: bf16[30,64], index: 1, kind: input, shape index: {}]   ;;  %s333_s3 = inlined_call_operand.vmem [shape: bf16[64,32], index: 3, kind: input, shape index: {}]   ;;  %s334_s2 = inlined_call_operand.vmem [shape: f32[1,64], index: 2, kind: input, shape index: {}]   ;;  %s335_s0 = inlined_call_operand.vmem [shape: bf16[8,30], index: 0, kind: input, shape index: {}]   ;;  %s336_s4 = inlined_call_operand.vmem [shape: f32[1,32], index: 4, kind: input, shape index: {}]   ;;  %s337_s6 = inlined_call_operand.vmem [shape: f32[1,2], index: 6, kind: input, shape index: {}]   ;;  %s338_s5 = inlined_call_operand.vmem [shape: bf16[32,2], index: 5, kind: input, shape index: {}]   ;;  %s339_s7 = inlined_call_operand.vmem [shape: f32[8,2], index: 7, kind: output, shape index: {}]  }
   0x1   :  { %v202_v0 = vld [vmem:[%s332_s1 + $0x8] sm:$0xf]  ;;  %v232_v1 = vld [vmem:[%s332_s1 + $0x8] sm:$0x70]  ;;  %v236_v3 = vld [vmem:[%s333_s3 + $0x18] sm:$0xff]  ;;  %vm188_vm5 = vcmask 7168  }
   0x2   :  { %v203_v2 = vor.u32 %v232_v1, %v202_v0  ;;  %114 = vmatpush.bf16.msra.mxu1 %v236_v3  ;;  %v235_v5 = vld [vmem:[%s333_s3 + $0x10] sm:$0xff]  ;;  %v231_v6 = vld [vmem:[%s332_s1] sm:$0xff]  ;;  %v234_v8 = vld [vmem:[%s333_s3 + $0x8] sm:$0xff]  ;;  %vm190_vm6 = vcmask 15360  }
   0x3   :  { %v27_v7 = vld [vmem:[%s335_s0] sm:$0xf]  ;;  %v238_v16 = vld [vmem:[%s338_s5 + $0x8] sm:$0xff] }
   0x4   :  { %v53_v4 = vsel %vm51_vm0, %v203_v2, 0  ;;  %v233_v9 = vld [vmem:[%s333_s3] sm:$0xff]  ;;  %155 = vmatpush.bf16.msra.mxu2 %v238_v16 }
   0x5   :  { %61 = vmatpush.bf16.msra.mxu0 %v53_v4  ;;  %v241_v10 = vld [vmem:[%s334_s2] ss:$0 sm:$0xff] }
   0x6   :  { %115 = vmatpush.bf16.msra.mxu1 %v235_v5  ;;  %v237_v17 = vld [vmem:[%s338_s5] sm:$0xff] }
   0x7   :  { %v242_v18 = vld [vmem:[%s336_s4] ss:$0 sm:$0xff]  ;;  %s249_s4 = smov 127  }
   0x8   :  { %156 = vmatpush.bf16.msra.mxu2 %v237_v17  ;;  %v243_v24 = vld [vmem:[%s337_s6] ss:$0 sm:$0xff] }
   0x9   :  { %62 = vmatpush.bf16.msra.mxu0 %v231_v6 }
   0xa   :  { %116 = vmatpush.bf16.msra.mxu1 %v234_v8 }
   0xc   :  { %204 = vmatmul.msk.bf16.vlgmr.msra.gmra.mxu0 %vm47_vm1, %v27_v7 }
   0xe   :  { %117 = vmatpush.bf16.msra.mxu1 %v233_v9 }
  0x89   :  { %v64_v11 = vpop.f32.mrf.mxu0 }
  0x8a   :  { %v65_v12 = vadd.f32 %v241_v10, %v64_v11 }
  0x8c   :  { %v68_v13 = vmax.f32 %v65_v12, 0.0 }
  0x8e   :  { %v69_v14 = vpack.c.bf16 %v68_v13, %v68_v13 }
  0x90   :  { %221 = vmatmul.msk.bf16.vlgmr.msra.gmra.mxu1 %vm106_vm2, %v69_v14 }
  0x91   :  { %v66_v15 = vpop.f32.mrf.mxu0 }
 0x10d   :  { %v119_v19 = vpop.f32.mrf.mxu1 }
 0x10e   :  { %v120_v20 = vadd.f32 %v242_v18, %v119_v19 }
 0x110   :  { %v123_v21 = vmax.f32 %v120_v20, 0.0 }
 0x112   :  { %v124_v22 = vpack.c.bf16 %v123_v21, %v123_v21 }
 0x114   :  { %230 = vmatmul.msk.bf16.vlgmr.msra.gmra.mxu2 %vm145_vm3, %v124_v22 }
 0x115   :  { %v121_v23 = vpop.f32.mrf.mxu1 }
 0x197   :  { %v158_v25 = vpop.f32.mrf.mxu2 }
 0x198   :  { %v159_v26 = vadd.f32 %v243_v24, %v158_v25 }
 0x19a   :  { %163 = vrot.lane.b32.xlu0 %v159_v26, %s248_s23 }
 0x19f   :  { %v160_v27 = vpop.f32.mrf.mxu2 }
 0x20c   :  { %v164_v28 = vpop.permute.xlu0 %163 }
 0x20d   :  { %v166_v29 = vsub.f32 %v159_v26, %v164_v28 }
 0x20f   :  { %v168_v30 = vand.u32 2147483647, %v166_v29  ;;  %v167_v41 = vmax.f32 %v166_v29, 0.0 }
 0x211   :  { %v169_v31 = vsub.f32 0.0, %v168_v30 }
 0x213   :  { %v170_v32 = vmul.f32 1.442695, %v169_v31 }
 0x215   :  { %244 = vpow2.f32 %v170_v32 }
 0x21b   :  { %v245_v33 = vpop.eup %244 }
 0x21c   :  { %v172_v34 = vadd.f32 1.0, %v245_v33  ;;  %v175_v35 = vmul.f32 -0.5, %v245_v33  ;;  %v178_v37 = vand.u32 2147483647, %v245_v33 }
 0x21e   :  { %246 = vlog2.f32 %v172_v34  ;;  %v176_v36 = vadd.f32 1.0, %v175_v35  ;;  %vm179_vm4 = vcmp.lt.f32.partialorder %v178_v37, 0.0004427343 }
 0x220   :  { %v177_v40 = vmul.f32 %v245_v33, %v176_v36 }
 0x224   :  { %v247_v38 = vpop.eup %246 }
 0x225   :  { %v174_v39 = vmul.f32 0.6931472, %v247_v38 }
 0x227   :  { %v180_v42 = vsel %vm179_vm4, %v177_v40, %v174_v39 }
 0x228   :  { %v181_v43 = vadd.f32 %v180_v42, %v167_v41 }
 0x22a   :  { %v183_v44 = vsub.f32 %v166_v29, %v181_v43  ;;  %v182_v45 = vsub.f32 0.0, %v181_v43 }
 0x22c   :  { %185 = vrot.lane.b32.xlu0 %v182_v45, %s249_s4 }
 0x29e   :  { %v186_v46 = vpop.permute.xlu0 %185 }
 0x29f   :  { %v189_v47 = vsel %vm188_vm5, %v186_v46, %v183_v44 }
 0x2a0   :  { %191 = vst.msk [vmem:[%s339_s7] sm:$0xff] %vm190_vm6, %v189_v47 }

</bundles_post_ra>
